<compile_context>
chip_gen: v7x
topology: tpu7x:2x2x1
jax: 0.10.0
libtpu: 0.0.40
codegen_flags: <defaults>
</compile_context>

<pallas_src>
import math
import functools

import jax
import jax.numpy as jnp
from jax import lax
from jax.experimental import pallas as pl
from jax.experimental.pallas import tpu as pltpu


_MASK_VALUE = -1e30  # large-negative (not -inf) so exp() never sees inf-inf


def _layernorm(h, gamma, beta, eps=1e-5):
    mu = jnp.mean(h, axis=-1, keepdims=True)
    var = jnp.mean((h - mu) ** 2, axis=-1, keepdims=True)
    return (h - mu) * lax.rsqrt(var + eps) * gamma + beta


def _gelu_tanh(x):
    c = math.sqrt(2.0 / math.pi)
    return 0.5 * x * (1.0 + jnp.tanh(c * (x + 0.044715 * x * x * x)))


# ---------------------------------------------------------------------------
# Kernel 1: LN1 + Q/K/V projection (once per token), heads split to (B,H,T,dh)
# ---------------------------------------------------------------------------
def qkv_kernel(x_ref, g1_ref, b1_ref,
               wq_ref, bq_ref, wk_ref, bk_ref, wv_ref, bv_ref,
               q_ref, k_ref, v_ref, *, num_heads: int, head_dim: int):
    f32, bf16 = jnp.float32, jnp.bfloat16
    H, dh = num_heads, head_dim
    scale = 1.0 / math.sqrt(dh)

    x = x_ref[0].astype(f32)                                     # (tt, D)
    h1 = _layernorm(x, g1_ref[...], b1_ref[...]).astype(bf16)

    q = (jnp.dot(h1, wq_ref[...], preferred_element_type=f32) + bq_ref[...]) * scale
    k = jnp.dot(h1, wk_ref[...], preferred_element_type=f32) + bk_ref[...]
    v = jnp.dot(h1, wv_ref[...], preferred_element_type=f32) + bv_ref[...]

    # Head split via static lane slices + per-head stores: this relayout is
    # paid ONCE per token here, instead of once per (q-tile, kv-tile) step.
    for h in range(H):
        sl = slice(h * dh, (h + 1) * dh)
        q_ref[0, h] = q[:, sl].astype(bf16)
        k_ref[0, h] = k[:, sl].astype(bf16)
        v_ref[0, h] = v[:, sl].astype(bf16)


# ---------------------------------------------------------------------------
# Kernel 2: causal flash attention + output projection + residual
# ---------------------------------------------------------------------------
def attn_kernel(x_ref, q_ref, k_ref, v_ref, wo_ref, bo_ref, o_ref,
                m_scr, l_scr, acc_scr,
                *, num_heads: int, head_dim: int, q_tile: int, kv_tile: int):
    f32, bf16 = jnp.float32, jnp.bfloat16
    H, dh = num_heads, head_dim
    tq, tkv = q_tile, kv_tile
    D = x_ref.shape[-1]

    qi = pl.program_id(1)
    ki = pl.program_id(2)
    nk = pl.num_programs(2)
    q_start = qi * tq
    kv_start = ki * tkv
    q_end = q_start + (tq - 1)
    kv_end = kv_start + (tkv - 1)

    @pl.when(ki == 0)
    def _init():
        m_scr[...] = jnp.full_like(m_scr, _MASK_VALUE)
        l_scr[...] = jnp.zeros_like(l_scr)
        acc_scr[...] = jnp.zeros_like(acc_scr)

    def _flash_step(apply_mask: bool):
        q = q_ref[0]                                             # (H, tq, dh) bf16, pre-scaled
        k = k_ref[0]                                             # (H, tkv, dh) bf16
        v = v_ref[0]                                             # (H, tkv, dh) bf16
        s = jnp.einsum("hqd,hkd->hqk", q, k,
                       preferred_element_type=f32)               # (H, tq, tkv) f32
        if apply_mask:
            # 2-D iota mask, broadcast over heads (no (H,tq,tkv) int32 iotas).
            rows = lax.broadcasted_iota(jnp.int32, (tq, tkv), 0) + q_start
            cols = lax.broadcasted_iota(jnp.int32, (tq, tkv), 1) + kv_start
            s = jnp.where((rows >= cols)[None, :, :], s, _MASK_VALUE)

        m_prev = m_scr[...]
        m_new = jnp.maximum(m_prev, s.max(axis=-1, keepdims=True))
        alpha = jnp.exp(m_prev - m_new)
        p = jnp.exp(s - m_new)
        l_scr[...] = alpha * l_scr[...] + p.sum(axis=-1, keepdims=True)
        acc_scr[...] = alpha * acc_scr[...] + jnp.einsum(
            "hqk,hkd->hqd", p.astype(bf16), v, preferred_element_type=f32)
        m_scr[...] = m_new

    # Causal block structure.  Invariant: ki == 0 always intersects the
    # visible region (every query row sees >= 1 unmasked key), so l > 0 at
    # finalize.  Tiles strictly above the diagonal are skipped here, and
    # their K/V DMAs are also elided by the clamped index_map in the wrapper.
    @pl.when(kv_end <= q_start)
    def _full_tile():
        _flash_step(apply_mask=False)

    @pl.when(jnp.logical_and(kv_start <= q_end, kv_end > q_start))
    def _diag_tile():
        _flash_step(apply_mask=True)

    @pl.when(ki == nk - 1)
    def _finalize():
        inv_l = pl.reciprocal(l_scr[...], approx=True)           # EUP vrcp
        ctx = acc_scr[...] * inv_l                               # (H, tq, dh) f32
        # Output projection as K-dim accumulation over heads (no concat
        # relayout; everything stays on the MXU).
        out = jnp.zeros((tq, D), f32)
        for h in range(H):
            out += jnp.dot(ctx[h].astype(bf16),
                           wo_ref[h * dh:(h + 1) * dh, :],
                           preferred_element_type=f32)
        x1 = x_ref[0].astype(f32) + out + bo_ref[...]            # dropout == id
        o_ref[0] = x1.astype(o_ref.dtype)


# ---------------------------------------------------------------------------
# Kernel 3: LN2 + FFN (streamed w1/w2 chunks) + residual
# ---------------------------------------------------------------------------
def ffn_kernel(x1_ref, g2_ref, b2_ref, w1_ref, bh1_ref, w2_ref, bh2_ref,
               o_ref, h2_scr, acc_scr):
    f32, bf16 = jnp.float32, jnp.bfloat16
    ci = pl.program_id(2)
    nc = pl.num_programs(2)

    @pl.when(ci == 0)
    def _init():
        x1 = x1_ref[0].astype(f32)
        h2_scr[...] = _layernorm(x1, g2_ref[...], b2_ref[...]).astype(bf16)
        acc_scr[...] = jnp.zeros_like(acc_scr)

    f = jnp.dot(h2_scr[...], w1_ref[...], preferred_element_type=f32) + bh1_ref[...]
    f = _gelu_tanh(f)
    acc_scr[...] += jnp.dot(f.astype(bf16), w2_ref[...], preferred_element_type=f32)

    @pl.when(ci == nc - 1)
    def _finalize():
        o_ref[0] = (x1_ref[0].astype(f32) + acc_scr[...]
                    + bh2_ref[...]).astype(o_ref.dtype)


# ---------------------------------------------------------------------------
# Wrapper
# ---------------------------------------------------------------------------
def _pick(n, candidates):
    for c in candidates:
        if n % c == 0:
            return c
    return n


def _default_vmem_limit():
    # Explicit scoped-VMEM limit (defaults of 16/32 MiB are too small once
    # weights/tiles grow).  ~100 MiB on 128 MiB parts (v5e/v6e), <=56 MiB with
    # headroom on 64 MiB parts (v7x).
    cap = 128 * 1024 * 1024
    try:
        info = pltpu.get_tpu_info()
        cap = int(getattr(info, "vmem_capacity_bytes", cap))
    except Exception:
        pass
    if cap >= 128 * 1024 * 1024:
        return 100 * 1024 * 1024
    return max(min(cap - 8 * 1024 * 1024, 56 * 1024 * 1024), 32 * 1024 * 1024)


def transformer_block(x, params, *, num_heads, q_tile=None, kv_tile=None,
                      proj_tile=None, ffn_chunk=None, vmem_limit_bytes=None):
    B, T, D = x.shape
    H = num_heads
    assert D % H == 0
    dh = D // H
    hidden = params["w1"].shape[1]

    tile_cands = (256, 128, 64, 32, 16, 8)
    tq = q_tile or _pick(T, tile_cands)
    tkv = kv_tile or _pick(T, tile_cands)
    tt = proj_tile or _pick(T, tile_cands)
    fc = ffn_chunk or _pick(hidden, (512, 256, 128))
    assert T % tq == 0 and T % tkv == 0 and T % tt == 0 and hidden % fc == 0

    vmem = vmem_limit_bytes or _default_vmem_limit()

    f32, bf16 = jnp.float32, jnp.bfloat16
    # MXU weights as bf16 (native MXU dtype, halves resident/streamed bytes);
    # LayerNorm params and biases stay f32.
    wq = params["wq"].astype(bf16)
    wk = params["wk"].astype(bf16)
    wv = params["wv"].astype(bf16)
    wo = params["wo"].astype(bf16)
    w1 = params["w1"].astype(bf16)
    w2 = params["w2"].astype(bf16)

    def const_spec(a):
        nd = a.ndim
        return pl.BlockSpec(a.shape, lambda *idx, _nd=nd: (0,) * _nd)

    # ---- Kernel 1: QKV projection ----------------------------------------
    qkv_consts = (params["ln1_g"], params["ln1_b"],
                  wq, params["bq"], wk, params["bk"], wv, params["bv"])
    q, k, v = pl.pallas_call(
        functools.partial(qkv_kernel, num_heads=H, head_dim=dh),
        out_shape=[jax.ShapeDtypeStruct((B, H, T, dh), bf16)] * 3,
        grid_spec=pltpu.PrefetchScalarGridSpec(
            num_scalar_prefetch=0,
            grid=(B, T // tt),
            in_specs=[pl.BlockSpec((1, tt, D), lambda b, ti: (b, ti, 0))]
                     + [const_spec(a) for a in qkv_consts],
            out_specs=[pl.BlockSpec((1, H, tt, dh),
                                    lambda b, ti: (b, 0, ti, 0))] * 3),
        compiler_params=pltpu.CompilerParams(
            dimension_semantics=("parallel", "parallel"),
            vmem_limit_bytes=vmem),
    )(x, *qkv_consts)

    # ---- Kernel 2: flash attention + out-proj + residual -----------------
    def kv_index(b, qi, ki):
        # Clamp above-diagonal steps to the last needed block: unchanged
        # block index => Pallas issues no DMA for causally-skipped tiles.
        return (b, 0, jnp.minimum(ki, (qi * tq + tq - 1) // tkv), 0)

    x1 = pl.pallas_call(
        functools.partial(attn_kernel, num_heads=H, head_dim=dh,
                          q_tile=tq, kv_tile=tkv),
        out_shape=jax.ShapeDtypeStruct((B, T, D), f32),
        grid_spec=pltpu.PrefetchScalarGridSpec(
            num_scalar_prefetch=0,
            grid=(B, T // tq, T // tkv),
            in_specs=[
                pl.BlockSpec((1, tq, D), lambda b, qi, ki: (b, qi, 0)),
                pl.BlockSpec((1, H, tq, dh), lambda b, qi, ki: (b, 0, qi, 0)),
                pl.BlockSpec((1, H, tkv, dh), kv_index),
                pl.BlockSpec((1, H, tkv, dh), kv_index),
                const_spec(wo),
                const_spec(params["bo"]),
            ],
            out_specs=pl.BlockSpec((1, tq, D), lambda b, qi, ki: (b, qi, 0)),
            scratch_shapes=[
                pltpu.VMEM((H, tq, 1), f32),    # running max
                pltpu.VMEM((H, tq, 1), f32),    # running sum
                pltpu.VMEM((H, tq, dh), f32),   # acc
            ]),
        compiler_params=pltpu.CompilerParams(
            dimension_semantics=("parallel", "parallel", "arbitrary"),
            vmem_limit_bytes=vmem),
    )(x, q, k, v, wo, params["bo"])

    # ---- Kernel 3: FFN with streamed w1/w2 chunks + residual --------------
    out = pl.pallas_call(
        ffn_kernel,
        out_shape=jax.ShapeDtypeStruct((B, T, D), x.dtype),
        grid_spec=pltpu.PrefetchScalarGridSpec(
            num_scalar_prefetch=0,
            grid=(B, T // tt, hidden // fc),
            in_specs=[
                pl.BlockSpec((1, tt, D), lambda b, ti, ci: (b, ti, 0)),
                const_spec(params["ln2_g"]),
                const_spec(params["ln2_b"]),
                pl.BlockSpec((D, fc), lambda b, ti, ci: (0, ci)),
                pl.BlockSpec((1, fc), lambda b, ti, ci: (0, ci)),
                pl.BlockSpec((fc, D), lambda b, ti, ci: (ci, 0)),
                const_spec(params["b2"]),
            ],
            out_specs=pl.BlockSpec((1, tt, D), lambda b, ti, ci: (b, ti, 0)),
            scratch_shapes=[
                pltpu.VMEM((tt, D), bf16),      # LN2(x1)
                pltpu.VMEM((tt, D), f32),       # FFN accumulator
            ]),
        compiler_params=pltpu.CompilerParams(
            dimension_semantics=("parallel", "parallel", "arbitrary"),
            vmem_limit_bytes=vmem),
    )(x1, params["ln2_g"], params["ln2_b"], w1, params["b1"], w2, params["b2"])

    return out


# ---------------------------------------------------------------------------
# Parameters / pure-JAX reference / tests
# ---------------------------------------------------------------------------
def init_params(key, emb_dim):
    # Linear weights stored as (in, out): kernels compute x @ W + b.
    D = emb_dim
    ks = jax.random.split(key, 8)
    std = 0.02

    def lin(k, din, dout):
        return std * jax.random.normal(k, (din, dout), jnp.float32)

    return {
        "ln1_g": jnp.ones((1, D), jnp.float32),
        "ln1_b": jnp.zeros((1, D), jnp.float32),
        "wq": lin(ks[0], D, D), "bq": jnp.zeros((1, D), jnp.float32),
        "wk": lin(ks[1], D, D), "bk": jnp.zeros((1, D), jnp.float32),
        "wv": lin(ks[2], D, D), "bv": jnp.zeros((1, D), jnp.float32),
        "wo": lin(ks[3], D, D), "bo": jnp.zeros((1, D), jnp.float32),
        "ln2_g": jnp.ones((1, D), jnp.float32),
        "ln2_b": jnp.zeros((1, D), jnp.float32),
        "w1": lin(ks[4], D, 4 * D), "b1": jnp.zeros((1, 4 * D), jnp.float32),
        "w2": lin(ks[5], 4 * D, D), "b2": jnp.zeros((1, D), jnp.float32),
    }


def reference_block(x, p, *, num_heads):
    B, T, D = x.shape
    dh = D // num_heads

    def ln(h, g, b):
        mu = jnp.mean(h, axis=-1, keepdims=True)
        var = jnp.mean((h - mu) ** 2, axis=-1, keepdims=True)
        return (h - mu) * lax.rsqrt(var + 1e-5) * g + b

    h = ln(x, p["ln1_g"], p["ln1_b"])
    q = h @ p["wq"] + p["bq"]
    k = h @ p["wk"] + p["bk"]
    v = h @ p["wv"] + p["bv"]
    q = q.reshape(B, T, num_heads, dh).transpose(0, 2, 1, 3)
    k = k.reshape(B, T, num_heads, dh).transpose(0, 2, 1, 3)
    v = v.reshape(B, T, num_heads, dh).transpose(0, 2, 1, 3)
    s = jnp.einsum("bhqd,bhkd->bhqk", q, k) / math.sqrt(dh)
    mask = jnp.tril(jnp.ones((T, T), bool))
    s = jnp.where(mask, s, _MASK_VALUE)
    a = jax.nn.softmax(s, axis=-1)
    ctx = jnp.einsum("bhqk,bhkd->bhqd", a, v).transpose(0, 2, 1, 3).reshape(B, T, D)
    x1 = x + (ctx @ p["wo"] + p["bo"])
    h2 = ln(x1, p["ln2_g"], p["ln2_b"])
    f = _gelu_tanh(h2 @ p["w1"] + p["b1"])
    f = f @ p["w2"] + p["b2"]
    return x1 + f


def _run_case(key, *, B, T, D, H, atol, q_tile=None, kv_tile=None):
    kx, kp = jax.random.split(key)
    x = jax.random.normal(kx, (B, T, D), jnp.float32)
    params = init_params(kp, D)
    out = jax.block_until_ready(
        transformer_block(x, params, num_heads=H, q_tile=q_tile, kv_tile=kv_tile))
    ref = reference_block(x, params, num_heads=H)
    assert out.shape == (B, T, D)
    err = float(jnp.max(jnp.abs(out - ref)))
    # Tolerance accounts for bf16 MXU inputs (f32 reference is exact).
    assert err < atol, f"max abs err {err} (atol {atol})"
    return err


if __name__ == "__main__":
    key = jax.random.PRNGKey(0)
    k1, k2 = jax.random.split(key)
    # Tiny single-tile case (matches the module's small config).
    _run_case(k1, B=2, T=8, D=32, H=4, atol=3e-2)
    # Multi-tile case: exercises causal block skipping, the clamped K/V
    # index_map, masked diagonal tiles, fully-visible tiles, and the
    # streamed-weight FFN chunk grid.
    _run_case(k2, B=1, T=256, D=256, H=4, atol=5e-2, q_tile=128, kv_tile=64)
    print("KERNEL_OK")
</pallas_src>

<mosaic_0001>
module attributes {stable_mosaic.version = 11 : i64} {
  func.func @qkv_kernel(%arg0: i32, %arg1: i32, %arg2: memref<1x8x32xf32, #tpu.memory_space<vmem>>, %arg3: memref<1x32xf32, #tpu.memory_space<vmem>>, %arg4: memref<1x32xf32, #tpu.memory_space<vmem>>, %arg5: memref<32x32xbf16, #tpu.memory_space<vmem>>, %arg6: memref<1x32xf32, #tpu.memory_space<vmem>>, %arg7: memref<32x32xbf16, #tpu.memory_space<vmem>>, %arg8: memref<1x32xf32, #tpu.memory_space<vmem>>, %arg9: memref<32x32xbf16, #tpu.memory_space<vmem>>, %arg10: memref<1x32xf32, #tpu.memory_space<vmem>>, %arg11: memref<1x4x8x8xbf16, #tpu.memory_space<vmem>>, %arg12: memref<1x4x8x8xbf16, #tpu.memory_space<vmem>>, %arg13: memref<1x4x8x8xbf16, #tpu.memory_space<vmem>>) attributes {dimension_semantics = [#tpu.dimension_semantics<parallel>, #tpu.dimension_semantics<parallel>], iteration_bounds = array<i64: 2, 1>, scalar_prefetch = 0 : i64, scratch_operands = 0 : i64, tpu.core_type = #tpu.core_type<tc>, window_params = [{transform_indices = @transform_0, window_bounds = array<i64: 1, 8, 32>}, {pipeline_mode = #tpu.pipeline_mode<synchronous>, transform_indices = @transform_1, window_bounds = array<i64: 1, 32>}, {pipeline_mode = #tpu.pipeline_mode<synchronous>, transform_indices = @transform_2, window_bounds = array<i64: 1, 32>}, {pipeline_mode = #tpu.pipeline_mode<synchronous>, transform_indices = @transform_3, window_bounds = array<i64: 32, 32>}, {pipeline_mode = #tpu.pipeline_mode<synchronous>, transform_indices = @transform_4, window_bounds = array<i64: 1, 32>}, {pipeline_mode = #tpu.pipeline_mode<synchronous>, transform_indices = @transform_5, window_bounds = array<i64: 32, 32>}, {pipeline_mode = #tpu.pipeline_mode<synchronous>, transform_indices = @transform_6, window_bounds = array<i64: 1, 32>}, {pipeline_mode = #tpu.pipeline_mode<synchronous>, transform_indices = @transform_7, window_bounds = array<i64: 32, 32>}, {pipeline_mode = #tpu.pipeline_mode<synchronous>, transform_indices = @transform_8, window_bounds = array<i64: 1, 32>}, {transform_indices = @transform_9, window_bounds = array<i64: 1, 4, 8, 8>}, {transform_indices = @transform_10, window_bounds = array<i64: 1, 4, 8, 8>}, {transform_indices = @transform_11, window_bounds = array<i64: 1, 4, 8, 8>}]} {
    %c0 = arith.constant 0 : index
    %c0_0 = arith.constant 0 : index
    %c0_1 = arith.constant 0 : index
    %0 = vector.load %arg2[%c0, %c0_0, %c0_1] : memref<1x8x32xf32, #tpu.memory_space<vmem>>, vector<1x8x32xf32>
    %1 = vector.shape_cast %0 : vector<1x8x32xf32> to vector<8x32xf32>
    %c0_2 = arith.constant 0 : index
    %c0_3 = arith.constant 0 : index
    %2 = vector.load %arg3[%c0_2, %c0_3] : memref<1x32xf32, #tpu.memory_space<vmem>>, vector<1x32xf32>
    %c0_4 = arith.constant 0 : index
    %c0_5 = arith.constant 0 : index
    %3 = vector.load %arg4[%c0_4, %c0_5] : memref<1x32xf32, #tpu.memory_space<vmem>>, vector<1x32xf32>
    %cst = arith.constant dense<0.000000e+00> : vector<8xf32>
    %4 = vector.multi_reduction <add>, %1, %cst [1] : vector<8x32xf32> to vector<8xf32>
    %5 = vector.shape_cast %4 : vector<8xf32> to vector<8x1xf32>
    %cst_6 = arith.constant 3.200000e+01 : f32
    %6 = vector.broadcast %cst_6 : f32 to vector<8x1xf32>
    %7 = arith.divf %5, %6 : vector<8x1xf32>
    %8 = vector.broadcast %7 : vector<8x1xf32> to vector<8x32xf32>
    %9 = arith.subf %1, %8 : vector<8x32xf32>
    %10 = arith.mulf %9, %9 : vector<8x32xf32>
    %cst_7 = arith.constant dense<0.000000e+00> : vector<8xf32>
    %11 = vector.multi_reduction <add>, %10, %cst_7 [1] : vector<8x32xf32> to vector<8xf32>
    %12 = vector.shape_cast %11 : vector<8xf32> to vector<8x1xf32>
    %cst_8 = arith.constant 3.200000e+01 : f32
    %13 = vector.broadcast %cst_8 : f32 to vector<8x1xf32>
    %14 = arith.divf %12, %13 : vector<8x1xf32>
    %15 = vector.broadcast %7 : vector<8x1xf32> to vector<8x32xf32>
    %16 = arith.subf %1, %15 : vector<8x32xf32>
    %cst_9 = arith.constant 9.99999974E-6 : f32
    %17 = vector.broadcast %cst_9 : f32 to vector<8x1xf32>
    %18 = arith.addf %14, %17 : vector<8x1xf32>
    %19 = math.rsqrt %18 : vector<8x1xf32>
    %20 = vector.broadcast %19 : vector<8x1xf32> to vector<8x32xf32>
    %21 = arith.mulf %16, %20 : vector<8x32xf32>
    %22 = vector.broadcast %2 : vector<1x32xf32> to vector<8x32xf32>
    %23 = arith.mulf %21, %22 : vector<8x32xf32>
    %24 = vector.broadcast %3 : vector<1x32xf32> to vector<8x32xf32>
    %25 = arith.addf %23, %24 : vector<8x32xf32>
    %26 = arith.truncf %25 : vector<8x32xf32> to vector<8x32xbf16>
    %c0_10 = arith.constant 0 : index
    %c0_11 = arith.constant 0 : index
    %27 = vector.load %arg5[%c0_10, %c0_11] : memref<32x32xbf16, #tpu.memory_space<vmem>>, vector<32x32xbf16>
    %cst_12 = arith.constant dense<0.000000e+00> : vector<8x32xf32>
    %28 = tpu.matmul %26, %27, %cst_12 {dimension_numbers = #tpu.dot_dimension_numbers<[1], [0], [0], [1], [0, 0, 1, 1], [], []>} : vector<8x32xbf16>, vector<32x32xbf16>, vector<8x32xf32> -> vector<8x32xf32>
    %c0_13 = arith.constant 0 : index
    %c0_14 = arith.constant 0 : index
    %29 = vector.load %arg6[%c0_13, %c0_14] : memref<1x32xf32, #tpu.memory_space<vmem>>, vector<1x32xf32>
    %30 = vector.broadcast %29 : vector<1x32xf32> to vector<8x32xf32>
    %31 = arith.addf %28, %30 : vector<8x32xf32>
    %cst_15 = arith.constant 0.353553385 : f32
    %32 = vector.broadcast %cst_15 : f32 to vector<8x32xf32>
    %33 = arith.mulf %31, %32 : vector<8x32xf32>
    %c0_16 = arith.constant 0 : index
    %c0_17 = arith.constant 0 : index
    %34 = vector.load %arg7[%c0_16, %c0_17] : memref<32x32xbf16, #tpu.memory_space<vmem>>, vector<32x32xbf16>
    %cst_18 = arith.constant dense<0.000000e+00> : vector<8x32xf32>
    %35 = tpu.matmul %26, %34, %cst_18 {dimension_numbers = #tpu.dot_dimension_numbers<[1], [0], [0], [1], [0, 0, 1, 1], [], []>} : vector<8x32xbf16>, vector<32x32xbf16>, vector<8x32xf32> -> vector<8x32xf32>
    %c0_19 = arith.constant 0 : index
    %c0_20 = arith.constant 0 : index
    %36 = vector.load %arg8[%c0_19, %c0_20] : memref<1x32xf32, #tpu.memory_space<vmem>>, vector<1x32xf32>
    %37 = vector.broadcast %36 : vector<1x32xf32> to vector<8x32xf32>
    %38 = arith.addf %35, %37 : vector<8x32xf32>
    %c0_21 = arith.constant 0 : index
    %c0_22 = arith.constant 0 : index
    %39 = vector.load %arg9[%c0_21, %c0_22] : memref<32x32xbf16, #tpu.memory_space<vmem>>, vector<32x32xbf16>
    %cst_23 = arith.constant dense<0.000000e+00> : vector<8x32xf32>
    %40 = tpu.matmul %26, %39, %cst_23 {dimension_numbers = #tpu.dot_dimension_numbers<[1], [0], [0], [1], [0, 0, 1, 1], [], []>} : vector<8x32xbf16>, vector<32x32xbf16>, vector<8x32xf32> -> vector<8x32xf32>
    %c0_24 = arith.constant 0 : index
    %c0_25 = arith.constant 0 : index
    %41 = vector.load %arg10[%c0_24, %c0_25] : memref<1x32xf32, #tpu.memory_space<vmem>>, vector<1x32xf32>
    %42 = vector.broadcast %41 : vector<1x32xf32> to vector<8x32xf32>
    %43 = arith.addf %40, %42 : vector<8x32xf32>
    %44 = vector.extract_strided_slice %33 {offsets = [0, 0], sizes = [8, 8], strides = [1, 1]} : vector<8x32xf32> to vector<8x8xf32>
    %45 = arith.truncf %44 : vector<8x8xf32> to vector<8x8xbf16>
    %c0_26 = arith.constant 0 : index
    %c0_27 = arith.constant 0 : index
    %c0_28 = arith.constant 0 : index
    %c0_29 = arith.constant 0 : index
    %46 = vector.load %arg11[%c0_26, %c0_27, %c0_28, %c0_29] : memref<1x4x8x8xbf16, #tpu.memory_space<vmem>>, vector<1x1x8x8xbf16>
    %47 = vector.shape_cast %46 : vector<1x1x8x8xbf16> to vector<8x8xbf16>
    %48 = vector.shape_cast %45 : vector<8x8xbf16> to vector<1x1x8x8xbf16>
    tpu.vector_store %arg11[%c0_26, %c0_27, %c0_28, %c0_29], %48 {strides = array<i32>} : memref<1x4x8x8xbf16, #tpu.memory_space<vmem>>, vector<1x1x8x8xbf16>,
    %49 = vector.extract_strided_slice %38 {offsets = [0, 0], sizes = [8, 8], strides = [1, 1]} : vector<8x32xf32> to vector<8x8xf32>
    %50 = arith.truncf %49 : vector<8x8xf32> to vector<8x8xbf16>
    %c0_30 = arith.constant 0 : index
    %c0_31 = arith.constant 0 : index
    %c0_32 = arith.constant 0 : index
    %c0_33 = arith.constant 0 : index
    %51 = vector.load %arg12[%c0_30, %c0_31, %c0_32, %c0_33] : memref<1x4x8x8xbf16, #tpu.memory_space<vmem>>, vector<1x1x8x8xbf16>
    %52 = vector.shape_cast %51 : vector<1x1x8x8xbf16> to vector<8x8xbf16>
    %53 = vector.shape_cast %50 : vector<8x8xbf16> to vector<1x1x8x8xbf16>
    tpu.vector_store %arg12[%c0_30, %c0_31, %c0_32, %c0_33], %53 {strides = array<i32>} : memref<1x4x8x8xbf16, #tpu.memory_space<vmem>>, vector<1x1x8x8xbf16>,
    %54 = vector.extract_strided_slice %43 {offsets = [0, 0], sizes = [8, 8], strides = [1, 1]} : vector<8x32xf32> to vector<8x8xf32>
    %55 = arith.truncf %54 : vector<8x8xf32> to vector<8x8xbf16>
    %c0_34 = arith.constant 0 : index
    %c0_35 = arith.constant 0 : index
    %c0_36 = arith.constant 0 : index
    %c0_37 = arith.constant 0 : index
    %56 = vector.load %arg13[%c0_34, %c0_35, %c0_36, %c0_37] : memref<1x4x8x8xbf16, #tpu.memory_space<vmem>>, vector<1x1x8x8xbf16>
    %57 = vector.shape_cast %56 : vector<1x1x8x8xbf16> to vector<8x8xbf16>
    %58 = vector.shape_cast %55 : vector<8x8xbf16> to vector<1x1x8x8xbf16>
    tpu.vector_store %arg13[%c0_34, %c0_35, %c0_36, %c0_37], %58 {strides = array<i32>} : memref<1x4x8x8xbf16, #tpu.memory_space<vmem>>, vector<1x1x8x8xbf16>,
    %59 = vector.extract_strided_slice %33 {offsets = [0, 8], sizes = [8, 8], strides = [1, 1]} : vector<8x32xf32> to vector<8x8xf32>
    %60 = arith.truncf %59 : vector<8x8xf32> to vector<8x8xbf16>
    %c0_38 = arith.constant 0 : index
    %c1 = arith.constant 1 : index
    %c0_39 = arith.constant 0 : index
    %c0_40 = arith.constant 0 : index
    %61 = vector.load %arg11[%c0_38, %c1, %c0_39, %c0_40] : memref<1x4x8x8xbf16, #tpu.memory_space<vmem>>, vector<1x1x8x8xbf16>
    %62 = vector.shape_cast %61 : vector<1x1x8x8xbf16> to vector<8x8xbf16>
    %63 = vector.shape_cast %60 : vector<8x8xbf16> to vector<1x1x8x8xbf16>
    tpu.vector_store %arg11[%c0_38, %c1, %c0_39, %c0_40], %63 {strides = array<i32>} : memref<1x4x8x8xbf16, #tpu.memory_space<vmem>>, vector<1x1x8x8xbf16>,
    %64 = vector.extract_strided_slice %38 {offsets = [0, 8], sizes = [8, 8], strides = [1, 1]} : vector<8x32xf32> to vector<8x8xf32>
    %65 = arith.truncf %64 : vector<8x8xf32> to vector<8x8xbf16>
    %c0_41 = arith.constant 0 : index
    %c1_42 = arith.constant 1 : index
    %c0_43 = arith.constant 0 : index
    %c0_44 = arith.constant 0 : index
    %66 = vector.load %arg12[%c0_41, %c1_42, %c0_43, %c0_44] : memref<1x4x8x8xbf16, #tpu.memory_space<vmem>>, vector<1x1x8x8xbf16>
    %67 = vector.shape_cast %66 : vector<1x1x8x8xbf16> to vector<8x8xbf16>
    %68 = vector.shape_cast %65 : vector<8x8xbf16> to vector<1x1x8x8xbf16>
    tpu.vector_store %arg12[%c0_41, %c1_42, %c0_43, %c0_44], %68 {strides = array<i32>} : memref<1x4x8x8xbf16, #tpu.memory_space<vmem>>, vector<1x1x8x8xbf16>,
    %69 = vector.extract_strided_slice %43 {offsets = [0, 8], sizes = [8, 8], strides = [1, 1]} : vector<8x32xf32> to vector<8x8xf32>
    %70 = arith.truncf %69 : vector<8x8xf32> to vector<8x8xbf16>
    %c0_45 = arith.constant 0 : index
    %c1_46 = arith.constant 1 : index
    %c0_47 = arith.constant 0 : index
    %c0_48 = arith.constant 0 : index
    %71 = vector.load %arg13[%c0_45, %c1_46, %c0_47, %c0_48] : memref<1x4x8x8xbf16, #tpu.memory_space<vmem>>, vector<1x1x8x8xbf16>
    %72 = vector.shape_cast %71 : vector<1x1x8x8xbf16> to vector<8x8xbf16>
    %73 = vector.shape_cast %70 : vector<8x8xbf16> to vector<1x1x8x8xbf16>
    tpu.vector_store %arg13[%c0_45, %c1_46, %c0_47, %c0_48], %73 {strides = array<i32>} : memref<1x4x8x8xbf16, #tpu.memory_space<vmem>>, vector<1x1x8x8xbf16>,
    %74 = vector.extract_strided_slice %33 {offsets = [0, 16], sizes = [8, 8], strides = [1, 1]} : vector<8x32xf32> to vector<8x8xf32>
    %75 = arith.truncf %74 : vector<8x8xf32> to vector<8x8xbf16>
    %c0_49 = arith.constant 0 : index
    %c2 = arith.constant 2 : index
    %c0_50 = arith.constant 0 : index
    %c0_51 = arith.constant 0 : index
    %76 = vector.load %arg11[%c0_49, %c2, %c0_50, %c0_51] : memref<1x4x8x8xbf16, #tpu.memory_space<vmem>>, vector<1x1x8x8xbf16>
    %77 = vector.shape_cast %76 : vector<1x1x8x8xbf16> to vector<8x8xbf16>
    %78 = vector.shape_cast %75 : vector<8x8xbf16> to vector<1x1x8x8xbf16>
    tpu.vector_store %arg11[%c0_49, %c2, %c0_50, %c0_51], %78 {strides = array<i32>} : memref<1x4x8x8xbf16, #tpu.memory_space<vmem>>, vector<1x1x8x8xbf16>,
    %79 = vector.extract_strided_slice %38 {offsets = [0, 16], sizes = [8, 8], strides = [1, 1]} : vector<8x32xf32> to vector<8x8xf32>
    %80 = arith.truncf %79 : vector<8x8xf32> to vector<8x8xbf16>
    %c0_52 = arith.constant 0 : index
    %c2_53 = arith.constant 2 : index
    %c0_54 = arith.constant 0 : index
    %c0_55 = arith.constant 0 : index
    %81 = vector.load %arg12[%c0_52, %c2_53, %c0_54, %c0_55] : memref<1x4x8x8xbf16, #tpu.memory_space<vmem>>, vector<1x1x8x8xbf16>
    %82 = vector.shape_cast %81 : vector<1x1x8x8xbf16> to vector<8x8xbf16>
    %83 = vector.shape_cast %80 : vector<8x8xbf16> to vector<1x1x8x8xbf16>
    tpu.vector_store %arg12[%c0_52, %c2_53, %c0_54, %c0_55], %83 {strides = array<i32>} : memref<1x4x8x8xbf16, #tpu.memory_space<vmem>>, vector<1x1x8x8xbf16>,
    %84 = vector.extract_strided_slice %43 {offsets = [0, 16], sizes = [8, 8], strides = [1, 1]} : vector<8x32xf32> to vector<8x8xf32>
    %85 = arith.truncf %84 : vector<8x8xf32> to vector<8x8xbf16>
    %c0_56 = arith.constant 0 : index
    %c2_57 = arith.constant 2 : index
    %c0_58 = arith.constant 0 : index
    %c0_59 = arith.constant 0 : index
    %86 = vector.load %arg13[%c0_56, %c2_57, %c0_58, %c0_59] : memref<1x4x8x8xbf16, #tpu.memory_space<vmem>>, vector<1x1x8x8xbf16>
    %87 = vector.shape_cast %86 : vector<1x1x8x8xbf16> to vector<8x8xbf16>
    %88 = vector.shape_cast %85 : vector<8x8xbf16> to vector<1x1x8x8xbf16>
    tpu.vector_store %arg13[%c0_56, %c2_57, %c0_58, %c0_59], %88 {strides = array<i32>} : memref<1x4x8x8xbf16, #tpu.memory_space<vmem>>, vector<1x1x8x8xbf16>,
    %89 = vector.extract_strided_slice %33 {offsets = [0, 24], sizes = [8, 8], strides = [1, 1]} : vector<8x32xf32> to vector<8x8xf32>
    %90 = arith.truncf %89 : vector<8x8xf32> to vector<8x8xbf16>
    %c0_60 = arith.constant 0 : index
    %c3 = arith.constant 3 : index
    %c0_61 = arith.constant 0 : index
    %c0_62 = arith.constant 0 : index
    %91 = vector.load %arg11[%c0_60, %c3, %c0_61, %c0_62] : memref<1x4x8x8xbf16, #tpu.memory_space<vmem>>, vector<1x1x8x8xbf16>
    %92 = vector.shape_cast %91 : vector<1x1x8x8xbf16> to vector<8x8xbf16>
    %93 = vector.shape_cast %90 : vector<8x8xbf16> to vector<1x1x8x8xbf16>
    tpu.vector_store %arg11[%c0_60, %c3, %c0_61, %c0_62], %93 {strides = array<i32>} : memref<1x4x8x8xbf16, #tpu.memory_space<vmem>>, vector<1x1x8x8xbf16>,
    %94 = vector.extract_strided_slice %38 {offsets = [0, 24], sizes = [8, 8], strides = [1, 1]} : vector<8x32xf32> to vector<8x8xf32>
    %95 = arith.truncf %94 : vector<8x8xf32> to vector<8x8xbf16>
    %c0_63 = arith.constant 0 : index
    %c3_64 = arith.constant 3 : index
    %c0_65 = arith.constant 0 : index
    %c0_66 = arith.constant 0 : index
    %96 = vector.load %arg12[%c0_63, %c3_64, %c0_65, %c0_66] : memref<1x4x8x8xbf16, #tpu.memory_space<vmem>>, vector<1x1x8x8xbf16>
    %97 = vector.shape_cast %96 : vector<1x1x8x8xbf16> to vector<8x8xbf16>
    %98 = vector.shape_cast %95 : vector<8x8xbf16> to vector<1x1x8x8xbf16>
    tpu.vector_store %arg12[%c0_63, %c3_64, %c0_65, %c0_66], %98 {strides = array<i32>} : memref<1x4x8x8xbf16, #tpu.memory_space<vmem>>, vector<1x1x8x8xbf16>,
    %99 = vector.extract_strided_slice %43 {offsets = [0, 24], sizes = [8, 8], strides = [1, 1]} : vector<8x32xf32> to vector<8x8xf32>
    %100 = arith.truncf %99 : vector<8x8xf32> to vector<8x8xbf16>
    %c0_67 = arith.constant 0 : index
    %c3_68 = arith.constant 3 : index
    %c0_69 = arith.constant 0 : index
    %c0_70 = arith.constant 0 : index
    %101 = vector.load %arg13[%c0_67, %c3_68, %c0_69, %c0_70] : memref<1x4x8x8xbf16, #tpu.memory_space<vmem>>, vector<1x1x8x8xbf16>
    %102 = vector.shape_cast %101 : vector<1x1x8x8xbf16> to vector<8x8xbf16>
    %103 = vector.shape_cast %100 : vector<8x8xbf16> to vector<1x1x8x8xbf16>
    tpu.vector_store %arg13[%c0_67, %c3_68, %c0_69, %c0_70], %103 {strides = array<i32>} : memref<1x4x8x8xbf16, #tpu.memory_space<vmem>>, vector<1x1x8x8xbf16>,
    return
  }
  func.func @transform_0(%arg0: i32, %arg1: i32) -> (i32, i32, i32) {
    %c0_i32 = arith.constant 0 : i32
    %c0_i32_0 = arith.constant 0 : i32
    return %arg0, %arg1, %c0_i32 : i32, i32, i32
  }
  func.func @transform_1(%arg0: i32, %arg1: i32) -> (i32, i32) {
    %c0_i32 = arith.constant 0 : i32
    %c0_i32_0 = arith.constant 0 : i32
    %c0_i32_1 = arith.constant 0 : i32
    return %c0_i32, %c0_i32_0 : i32, i32
  }
  func.func @transform_2(%arg0: i32, %arg1: i32) -> (i32, i32) {
    %c0_i32 = arith.constant 0 : i32
    %c0_i32_0 = arith.constant 0 : i32
    %c0_i32_1 = arith.constant 0 : i32
    return %c0_i32, %c0_i32_0 : i32, i32
  }
  func.func @transform_3(%arg0: i32, %arg1: i32) -> (i32, i32) {
    %c0_i32 = arith.constant 0 : i32
    %c0_i32_0 = arith.constant 0 : i32
    %c0_i32_1 = arith.constant 0 : i32
    return %c0_i32, %c0_i32_0 : i32, i32
  }
  func.func @transform_4(%arg0: i32, %arg1: i32) -> (i32, i32) {
    %c0_i32 = arith.constant 0 : i32
    %c0_i32_0 = arith.constant 0 : i32
    %c0_i32_1 = arith.constant 0 : i32
    return %c0_i32, %c0_i32_0 : i32, i32
  }
  func.func @transform_5(%arg0: i32, %arg1: i32) -> (i32, i32) {
    %c0_i32 = arith.constant 0 : i32
    %c0_i32_0 = arith.constant 0 : i32
    %c0_i32_1 = arith.constant 0 : i32
    return %c0_i32, %c0_i32_0 : i32, i32
  }
  func.func @transform_6(%arg0: i32, %arg1: i32) -> (i32, i32) {
    %c0_i32 = arith.constant 0 : i32
    %c0_i32_0 = arith.constant 0 : i32
    %c0_i32_1 = arith.constant 0 : i32
    return %c0_i32, %c0_i32_0 : i32, i32
  }
  func.func @transform_7(%arg0: i32, %arg1: i32) -> (i32, i32) {
    %c0_i32 = arith.constant 0 : i32
    %c0_i32_0 = arith.constant 0 : i32
    %c0_i32_1 = arith.constant 0 : i32
    return %c0_i32, %c0_i32_0 : i32, i32
  }
  func.func @transform_8(%arg0: i32, %arg1: i32) -> (i32, i32) {
    %c0_i32 = arith.constant 0 : i32
    %c0_i32_0 = arith.constant 0 : i32
    %c0_i32_1 = arith.constant 0 : i32
    return %c0_i32, %c0_i32_0 : i32, i32
  }
  func.func @transform_9(%arg0: i32, %arg1: i32) -> (i32, i32, i32, i32) {
    %c0_i32 = arith.constant 0 : i32
    %c0_i32_0 = arith.constant 0 : i32
    %c0_i32_1 = arith.constant 0 : i32
    return %arg0, %c0_i32, %arg1, %c0_i32_0 : i32, i32, i32, i32
  }
  func.func @transform_10(%arg0: i32, %arg1: i32) -> (i32, i32, i32, i32) {
    %c0_i32 = arith.constant 0 : i32
    %c0_i32_0 = arith.constant 0 : i32
    %c0_i32_1 = arith.constant 0 : i32
    return %arg0, %c0_i32, %arg1, %c0_i32_0 : i32, i32, i32, i32
  }
  func.func @transform_11(%arg0: i32, %arg1: i32) -> (i32, i32, i32, i32) {
    %c0_i32 = arith.constant 0 : i32
    %c0_i32_0 = arith.constant 0 : i32
    %c0_i32_1 = arith.constant 0 : i32
    return %arg0, %c0_i32, %arg1, %c0_i32_0 : i32, i32, i32, i32
  }
}

</mosaic_0001>

<bundles_post_ra>
// kernel: tpu_custom_call.1
= control target key start
LH: loop header
LB: loop body
LE: loop exit
PB: predicated region body
PF: predicated region fallthrough
CT: control target
= control target key end

     0   :  { %s2388_s0 = inlined_call_operand.hbm [shape: f32[2,8,32], index: 0, kind: input, shape index: {}]   ;;  %s2389_s1 = inlined_call_operand.hbm [shape: f32[1,32], index: 1, kind: input, shape index: {}]   ;;  %s2390_s2 = inlined_call_operand.hbm [shape: f32[1,32], index: 2, kind: input, shape index: {}]   ;;  %s2391_s3 = inlined_call_operand.hbm [shape: bf16[32,32], index: 3, kind: input, shape index: {}]   ;;  %s2392_s4 = inlined_call_operand.hbm [shape: f32[1,32], index: 4, kind: input, shape index: {}]   ;;  %s2393_s5 = inlined_call_operand.hbm [shape: bf16[32,32], index: 5, kind: input, shape index: {}]   ;;  %s2394_s6 = inlined_call_operand.hbm [shape: f32[1,32], index: 6, kind: input, shape index: {}]   ;;  %s2395_s7 = inlined_call_operand.hbm [shape: bf16[32,32], index: 7, kind: input, shape index: {}]   ;;  %s2396_s8 = inlined_call_operand.hbm [shape: f32[1,32], index: 8, kind: input, shape index: {}]   ;;  %s2397_s9 = inlined_call_operand.hbm [shape: bf16[2,4,8,8], index: 9, kind: output, shape index: {0}]   ;;  %s2398_s10 = inlined_call_operand.hbm [shape: bf16[2,4,8,8], index: 10, kind: output, shape index: {1}]   ;;  %s2399_s11 = inlined_call_operand.hbm [shape: bf16[2,4,8,8], index: 11, kind: output, shape index: {2}]  }
   0x1   :  { %2411 = sst [smem:[#allocation29_spill]] %s2388_s0 }
   0x2   :  { %2412 = sst [smem:[#allocation30_spill]] %s2389_s1 }
   0x3   :  { %2413 = sst [smem:[#allocation31_spill]] %s2390_s2 }
   0x4   :  { %2414 = sst [smem:[#allocation32_spill]] %s2391_s3 }
   0x5   :  { %2415 = sst [smem:[#allocation33_spill]] %s2397_s9 }
   0x6   :  { %2416 = sst [smem:[#allocation34_spill]] %s2398_s10 }
   0x7   :  { %2417 = sst [smem:[#allocation35_spill]] %s2399_s11 }
   0x8   :  { %17 = vsyncpa [#allocation3], 0 }
   0x9   :  { %19 = vsyncpa [#allocation3 + $0x1], 0 }
   0xa   :  { %20 = vsyncpa [#allocation6], 0 }
   0xb   :  { %21 = vsyncpa [#allocation9], 0 }
   0xc   :  { %22 = vsyncpa [#allocation12], 0 }
   0xd   :  { %23 = vsyncpa [#allocation15], 0 }
   0xe   :  { %24 = vsyncpa [#allocation4], 0 }
   0xf   :  { %26 = vsyncpa [#allocation4 + $0x1], 0 }
  0x10   :  { %27 = vsyncpa [#allocation19], 0 }
  0x11   :  { %29 = vsyncpa [#allocation19 + $0x1], 0  ;;  %s1887_s17 = smov 0   ;;  %s1889_s18 = smov 0  }
  0x12   :  { %s1891_s19 = smov 0   ;;  %s1893_s20 = smov 0  }
  0x13   :  { %s1895_s21 = smov 0   ;;  %s1897_s22 = smov 0  }
  0x14 LB: > { %2418 = sst [smem:[#allocation28_spill]] %s1796_s20  ;;  %s1918_s23 = sadd.s32 4294967295, %s1804_s22   ;;  %s1804_s22 = sphi %s1897_s22, %s35_s22   ;;  %s1800_s21 = sphi %s1895_s21, %s2456_s21   ;;  %s1796_s20 = sphi %s1893_s20, %s2455_s20   ;;  %s1792_s19 = sphi %s1891_s19, %s2454_s19   ;;  %s1788_s18 = sphi %s1889_s18, %s2453_s18   ;;  %s1784_s17 = sphi %s1887_s17, %s2452_s17  }
  0x15   : > { %p1121_p0 = scmp.ge.s32.totalorder %s1804_s22, 1  ;;  %p2401_p1 = scmp.eq.s32.totalorder %s1918_s23, 0 }
  0x16   : > { %p332_p2 = scmp.lt.s32.totalorder %s1804_s22, 3  ;;  %s1806_s25 = smov [#allocation5]  }
  0x17   : > { %s345_s26 = sshll.u32 %s1806_s25, 4  ;;  %s1807_s27 = smov [#allocation8]   ;;  %s346_s26 = int_to_ptr.vmem [resolvable:$true] %s345_s26 }
  0x18   : > { %p1923_p3 = pnand %p1121_p0, %p332_p2  ;;  %s366_s28 = sshll.u32 %s1807_s27, 4  ;;  %s1936_s28 = int_to_ptr.vmem [resolvable:$true] %s366_s28 }
  0x19   : > { %s1808_s30 = smov [#allocation11]   ;;  %s2421_s1 = sld [smem:[#allocation30_spill]] }
  0x1a   : > { %s2419_s24 = scalar_select %p1923_p3, 1, 0 }
  0x1b   : > { %p1262_p5 = pneg %p1923_p3  ;;  %s1938_s12 = sshll.u32 %s1808_s30, 4  ;;  %s391_s12 = int_to_ptr.vmem [resolvable:$true] %s1938_s12 }
  0x1d   : > { %p1932_p6 = pnand %p1262_p5, %p2401_p1 }
  0x1f   : > { %s1392_s15 = scalar_lea.hbm %s2421_s1, 16  ;;  %p1948_p8 = pneg %p1932_p6 }
  0x20   : > { %p1393_p7 = scmp.ne.s32.totalorder %s2421_s1, %s1392_s15  ;;  %p1399_p11 = scmp.lt.u32.totalorder %s1392_s15, %s2421_s1 }
  0x22   : > { %p1395_p9 = pnand %p1948_p8, %p1393_p7 }
  0x24   : > { %p1396_p10 = pneg %p1395_p9 }
  0x26   : > { %p1401_p12 = pnand %p1399_p11, %p1396_p10 }
  0x28   : > { %1404 = shalt.err (!%p1401_p12)
}
  0x29   : > { %s1405_s13 = scalar_lea.vmem %s346_s26, 16  ;;  %s1412_s14 = scalar_lea.vmem %s346_s26, 32 }
  0x2a   : > { %p1406_p13 = scmp.ne.s32.totalorder %s346_s26, %s1405_s13  ;;  %p1413_p5 = scmp.lt.s32.totalorder %s346_s26, %s346_s26 }
  0x2b   : > { %p1414_p4 = scmp.lt.s32.totalorder %s1412_s14, %s1405_s13 }
  0x2c   : > { %p1408_p0 = pnand %p1406_p13, %p1948_p8 }
  0x2d   : > { %p1415_p1 = por %p1414_p4, %p1413_p5 }
  0x2e   : > { %p1409_p2 = pneg %p1408_p0 }
  0x30   : > { %p1416_p3 = pnand %p1415_p1, %p1409_p2 }
  0x32   : > { %1419 = shalt.err (!%p1416_p3)
}
  0x33   : > { %1265 = dma.hbm_to_vmem [thread:$0]  (!%p1932_p6), %s2421_s1, 16, %s346_s26, [#allocation6]  }
  0x34   : > { %s2423_s3 = sld [smem:[#allocation32_spill]] }
  0x3a   : > { %s1420_s30 = scalar_lea.hbm %s2423_s3, 256 }
  0x3b   : > { %p1421_p7 = scmp.ne.s32.totalorder %s2423_s3, %s1420_s30  ;;  %p1427_p1 = scmp.lt.u32.totalorder %s1420_s30, %s2423_s3 }
  0x3d   : > { %p1423_p9 = pnand %p1421_p7, %p1948_p8 }
  0x3f   : > { %p1424_p4 = pneg %p1423_p9 }
  0x41   : > { %p1429_p3 = pnand %p1427_p1, %p1424_p4 }
  0x43   : > { %1432 = shalt.err (!%p1429_p3)
}
  0x44   : > { %s1433_s26 = scalar_lea.vmem %s1936_s28, 256  ;;  %p1441_p13 = scmp.lt.s32.totalorder %s1936_s28, %s1936_s28 }
  0x45   : > { %p1434_p10 = scmp.ne.s32.totalorder %s1936_s28, %s1433_s26  ;;  %p1442_p0 = scmp.lt.s32.totalorder %s1433_s26, %s1433_s26 }
  0x47   : > { %p1436_p11 = pnand %p1434_p10, %p1948_p8  ;;  %p1443_p2 = por %p1442_p0, %p1441_p13 }
  0x49   : > { %p1437_p12 = pneg %p1436_p11 }
  0x4b   : > { %p1444_p5 = pnand %p1443_p2, %p1437_p12 }
  0x4d   : > { %1447 = shalt.err (!%p1444_p5)
}
  0x4e   : > { %s1809_s9 = smov 64   ;;  %s1810_s10 = smov 4  }
  0x4f   : > { %1271 = dma.hbm_to_vmem [thread:$0]  (!%p1932_p6), %s2423_s3, 256, %s1936_s28, [#allocation9], %s1809_s9, %s1809_s9, %s1810_s10  }
  0x50   : > { %s1448_s30 = scalar_lea.hbm %s2393_s5, 256 }
  0x51   : > { %p1449_p7 = scmp.ne.s32.totalorder %s2393_s5, %s1448_s30  ;;  %p1455_p1 = scmp.lt.u32.totalorder %s1448_s30, %s2393_s5 }
  0x53   : > { %p1451_p9 = pnand %p1449_p7, %p1948_p8 }
  0x55   : > { %p1452_p4 = pneg %p1451_p9 }
  0x57   : > { %p1457_p3 = pnand %p1455_p1, %p1452_p4 }
  0x59   : > { %1460 = shalt.err (!%p1457_p3)
}
  0x5a   : > { %s1461_s16 = scalar_lea.vmem %s391_s12, 256  ;;  %p1469_p13 = scmp.lt.s32.totalorder %s391_s12, %s391_s12 }
  0x5b   : > { %p1462_p10 = scmp.ne.s32.totalorder %s391_s12, %s1461_s16  ;;  %p1470_p0 = scmp.lt.s32.totalorder %s1461_s16, %s1461_s16 }
  0x5d   : > { %p1464_p11 = pnand %p1462_p10, %p1948_p8  ;;  %p1471_p2 = por %p1470_p0, %p1469_p13 }
  0x5f   : > { %p1465_p12 = pneg %p1464_p11 }
  0x61   : > { %p1472_p5 = pnand %p1471_p2, %p1465_p12 }
  0x63   : > { %1475 = shalt.err (!%p1472_p5)
}
  0x64   : > { %1277 = dma.hbm_to_vmem [thread:$0]  (!%p1932_p6), %s2393_s5, 256, %s391_s12, [#allocation12], %s1809_s9, %s1809_s9, %s1810_s10  }
  0x65   : > { %s1811_s25 = smov [#allocation14]   ;;  %s1812_s15 = smov [#allocation7]  }
  0x66   : > { %s414_s11 = sshll.u32 %s1811_s25, 4  ;;  %s356_s30 = sshll.u32 %s1812_s15, 4  ;;  %s415_s11 = int_to_ptr.vmem [resolvable:$true] %s414_s11  ;;  %s357_s30 = int_to_ptr.vmem [resolvable:$true] %s356_s30 }
  0x67   : > { %s1476_s26 = scalar_lea.hbm %s2395_s7, 256 }
  0x68   : > { %p1477_p7 = scmp.ne.s32.totalorder %s2395_s7, %s1476_s26  ;;  %p1483_p1 = scmp.lt.u32.totalorder %s1476_s26, %s2395_s7 }
  0x6a   : > { %p1479_p9 = pnand %p1477_p7, %p1948_p8 }
  0x6c   : > { %p1480_p4 = pneg %p1479_p9 }
  0x6e   : > { %p1485_p3 = pnand %p1483_p1, %p1480_p4 }
  0x70   : > { %1488 = shalt.err (!%p1485_p3)
}
  0x71   : > { %s1489_s12 = scalar_lea.vmem %s415_s11, 256  ;;  %p1497_p13 = scmp.lt.s32.totalorder %s415_s11, %s415_s11 }
  0x72   : > { %p1490_p10 = scmp.ne.s32.totalorder %s415_s11, %s1489_s12  ;;  %p1498_p0 = scmp.lt.s32.totalorder %s1489_s12, %s1489_s12 }
  0x74   : > { %p1492_p11 = pnand %p1490_p10, %p1948_p8  ;;  %p1499_p2 = por %p1498_p0, %p1497_p13 }
  0x76   : > { %p1493_p12 = pneg %p1492_p11 }
  0x78   : > { %p1500_p5 = pnand %p1499_p2, %p1493_p12 }
  0x7a   : > { %1503 = shalt.err (!%p1500_p5)
}
  0x7b   : > { %1283 = dma.hbm_to_vmem [thread:$0]  (!%p1932_p6), %s2395_s7, 256, %s415_s11, [#allocation15], %s1809_s9, %s1809_s9, %s1810_s10  }
  0x7c   : > { %s2424_s2 = sld [smem:[#allocation31_spill]] }
  0x82   : > { %s1504_s15 = scalar_lea.hbm %s2424_s2, 16 }
  0x83   : > { %p1505_p7 = scmp.ne.s32.totalorder %s2424_s2, %s1504_s15  ;;  %p1511_p1 = scmp.lt.u32.totalorder %s1504_s15, %s2424_s2 }
  0x85   : > { %p1507_p9 = pnand %p1505_p7, %p1948_p8 }
  0x87   : > { %p1508_p4 = pneg %p1507_p9 }
  0x89   : > { %p1513_p3 = pnand %p1511_p1, %p1508_p4 }
  0x8b   : > { %1516 = shalt.err (!%p1513_p3)
}
  0x8c   : > { %s1517_s1 = scalar_lea.vmem %s357_s30, 16  ;;  %s1524_s9 = scalar_lea.vmem %s357_s30, 32 }
  0x8d   : > { %p1518_p10 = scmp.ne.s32.totalorder %s357_s30, %s1517_s1  ;;  %p1525_p13 = scmp.lt.s32.totalorder %s357_s30, %s357_s30 }
  0x8e   : > { %p1526_p0 = scmp.lt.s32.totalorder %s1524_s9, %s1517_s1 }
  0x8f   : > { %p1520_p11 = pnand %p1518_p10, %p1948_p8 }
  0x90   : > { %p1527_p2 = por %p1526_p0, %p1525_p13 }
  0x91   : > { %p1521_p12 = pneg %p1520_p11 }
  0x93   : > { %p1528_p5 = pnand %p1527_p2, %p1521_p12 }
  0x95   : > { %1531 = shalt.err (!%p1528_p5)
}
  0x96   : > { %1268 = dma.hbm_to_vmem [thread:$0]  (!%p1932_p6), %s2424_s2, 16, %s357_s30, [#allocation6]  }
  0x97   : > { %s1813_s12 = smov [#allocation10]   ;;  %s1814_s20 = smov [#allocation13]  }
  0x98   : > { %s380_s3 = sshll.u32 %s1813_s12, 4  ;;  %s404_s28 = sshll.u32 %s1814_s20, 4  ;;  %s381_s3 = int_to_ptr.vmem [resolvable:$true] %s380_s3  ;;  %s405_s28 = int_to_ptr.vmem [resolvable:$true] %s404_s28 }
  0x99   : > { %s1532_s13 = scalar_lea.hbm %s2392_s4, 16 }
  0x9a   : > { %p1533_p7 = scmp.ne.s32.totalorder %s2392_s4, %s1532_s13  ;;  %p1539_p1 = scmp.lt.u32.totalorder %s1532_s13, %s2392_s4 }
  0x9c   : > { %p1535_p9 = pnand %p1533_p7, %p1948_p8 }
  0x9e   : > { %p1536_p4 = pneg %p1535_p9 }
  0xa0   : > { %p1541_p3 = pnand %p1539_p1, %p1536_p4 }
  0xa2   : > { %1544 = shalt.err (!%p1541_p3)
}
  0xa3   : > { %s1545_s30 = scalar_lea.vmem %s381_s3, 16  ;;  %s1552_s9 = scalar_lea.vmem %s381_s3, 32 }
  0xa4   : > { %p1546_p10 = scmp.ne.s32.totalorder %s381_s3, %s1545_s30  ;;  %p1553_p13 = scmp.lt.s32.totalorder %s381_s3, %s381_s3 }
  0xa5   : > { %p1554_p0 = scmp.lt.s32.totalorder %s1552_s9, %s1545_s30 }
  0xa6   : > { %p1548_p11 = pnand %p1546_p10, %p1948_p8 }
  0xa7   : > { %p1555_p2 = por %p1554_p0, %p1553_p13 }
  0xa8   : > { %p1549_p12 = pneg %p1548_p11 }
  0xaa   : > { %p1556_p5 = pnand %p1555_p2, %p1549_p12 }
  0xac   : > { %1559 = shalt.err (!%p1556_p5)
}
  0xad   : > { %1274 = dma.hbm_to_vmem [thread:$0]  (!%p1932_p6), %s2392_s4, 16, %s381_s3, [#allocation9]  }
  0xae   : > { %s1560_s25 = scalar_lea.hbm %s2394_s6, 16 }
  0xaf   : > { %p1561_p7 = scmp.ne.s32.totalorder %s2394_s6, %s1560_s25  ;;  %p1567_p1 = scmp.lt.u32.totalorder %s1560_s25, %s2394_s6 }
  0xb1   : > { %p1563_p9 = pnand %p1561_p7, %p1948_p8 }
  0xb3   : > { %p1564_p4 = pneg %p1563_p9 }
  0xb5   : > { %p1569_p3 = pnand %p1567_p1, %p1564_p4 }
  0xb7   : > { %1572 = shalt.err (!%p1569_p3)
}
  0xb8   : > { %s1573_s16 = scalar_lea.vmem %s405_s28, 16  ;;  %s1580_s3 = scalar_lea.vmem %s405_s28, 32 }
  0xb9   : > { %p1574_p10 = scmp.ne.s32.totalorder %s405_s28, %s1573_s16  ;;  %p1581_p13 = scmp.lt.s32.totalorder %s405_s28, %s405_s28 }
  0xba   : > { %p1582_p0 = scmp.lt.s32.totalorder %s1580_s3, %s1573_s16 }
  0xbb   : > { %p1576_p11 = pnand %p1574_p10, %p1948_p8 }
  0xbc   : > { %p1583_p2 = por %p1582_p0, %p1581_p13 }
  0xbd   : > { %p1577_p12 = pneg %p1576_p11 }
  0xbf   : > { %p1584_p5 = pnand %p1583_p2, %p1577_p12 }
  0xc1   : > { %1587 = shalt.err (!%p1584_p5)
}
  0xc2   : > { %1280 = dma.hbm_to_vmem [thread:$0]  (!%p1932_p6), %s2394_s6, 16, %s405_s28, [#allocation12]  }
  0xc3   : > { %s1815_s9 = smov [#allocation16]   ;;  %s1588_s20 = scalar_lea.hbm %s2396_s8, 16 }
  0xc4   : > { %s428_s10 = sshll.u32 %s1815_s9, 4  ;;  %p1589_p7 = scmp.ne.s32.totalorder %s2396_s8, %s1588_s20  ;;  %s429_s10 = int_to_ptr.vmem [resolvable:$true] %s428_s10 }
  0xc5   : > { %p1595_p1 = scmp.lt.u32.totalorder %s1588_s20, %s2396_s8 }
  0xc6   : > { %p1591_p9 = pnand %p1589_p7, %p1948_p8 }
  0xc8   : > { %p1592_p4 = pneg %p1591_p9 }
  0xca   : > { %p1597_p3 = pnand %p1595_p1, %p1592_p4 }
  0xcc   : > { %1600 = shalt.err (!%p1597_p3)
}
  0xcd   : > { %s1601_s28 = scalar_lea.vmem %s429_s10, 16  ;;  %s1608_s26 = scalar_lea.vmem %s429_s10, 32 }
  0xce   : > { %p1602_p10 = scmp.ne.s32.totalorder %s429_s10, %s1601_s28  ;;  %p1609_p13 = scmp.lt.s32.totalorder %s429_s10, %s429_s10 }
  0xcf   : > { %p1610_p0 = scmp.lt.s32.totalorder %s1608_s26, %s1601_s28 }
  0xd0   : > { %p1604_p11 = pnand %p1602_p10, %p1948_p8 }
  0xd1   : > { %p1611_p2 = por %p1610_p0, %p1609_p13 }
  0xd2   : > { %p1605_p12 = pneg %p1604_p11 }
  0xd4   : > { %p1612_p5 = pnand %p1611_p2, %p1605_p12 }
  0xd6   : > { %1615 = shalt.err (!%p1612_p5)
}
  0xd7   : > { %1286 = dma.hbm_to_vmem [thread:$0]  (!%p1932_p6), %s2396_s8, 16, %s429_s10, [#allocation15]  }
  0xd8   : > { %s2405_s27 = sadd.s32 4294967294, %s1804_s22   ;;  %s47_s1 = sadd.s32 1, %s1800_s21 }
  0xd9   : > { %p49_p8 = scmp.ge.s32.totalorder %s47_s1, 2  ;;  %s56_s29 = sadd.s32 1, %s1792_s19 }
  0xda   : > { %p63_p7 = scmp.ne.s32.totalorder %s1792_s19, %s1788_s18  ;;  %p64_p9 = scmp.eq.s32.totalorder %s1804_s22, 0 }
  0xdb   : > { %s2458_s1 = smov (%p49_p8, %s47_s1), 0  ;;  %p69_p1 = scmp.ne.s32.totalorder %s1788_s18, %s1784_s17 }
  0xdc   : > { %p2113_p4 = por %p64_p9, %p63_p7  ;;  %s51_s9 = ssub.s32 %s1800_s21, %s2458_s1 }
  0xdd   : > { %p263_p6 = scmp.eq.s32.totalorder %s1918_s23, 1  ;;  %p54_p3 = scmp.eq.s32.totalorder %s51_s9, 0 }
  0xde   : > { %p2426_p10 = scmp.eq.s32.totalorder %s1918_s23, 0  ;;  %p269_p13 = scmp.eq.s32.totalorder %s2405_s27, 1 }
  0xdf   : > { %p2128_p12 = por %p263_p6, %p63_p7  ;;  %p1309_p2 = scmp.lt.s32.totalorder %s1804_s22, 2 }
  0xe0   : > { %p2124_p11 = por %p2426_p10, %p69_p1  ;;  %p2137_p0 = por %p269_p13, %p69_p1 }
  0xe1   : > { %s2428_s11 = scalar_select %p2128_p12, 1, 0 }
  0xe2   : > { %s2135_s12 = scalar_select %p54_p3, %s1792_s19, %s56_s29  }
  0xe3   : > { %s2429_s20 = scalar_select %p2137_p0, 1, 0 }
  0xe4   : > { %s439_s25 = sand.u32 1, %s1792_s19   ;;  %s1132_s15 = sshll.u32 %s1800_s21, 7 }
  0xe5   : > { %s1131_s13 = sshll.u32 %s439_s25, 3  ;;  %s2430_s0 = sld [smem:[#allocation29_spill]] }
  0xe6   : > { %s443_s16 = scalar_lea.vmem [#allocation2], %s1131_s13  ;;  %p2151_p5 = pnand %p1309_p2, %p2113_p4 }
  0xe7   : > { %s451_s3 = sshll.u32 %s443_s16, 4  ;;  %s440_s9 = scalar_lea.sflag [#allocation3], %s439_s25  ;;  %s2155_s3 = int_to_ptr.vmem [resolvable:$true] %s451_s3 }
  0xe8   : > { %p1618_p7 = pneg %p2151_p5 }
  0xeb   : > { %s2147_s26 = scalar_lea.hbm %s2430_s0, %s1132_s15  ;;  %s1621_s30 = scalar_lea.hbm %s2430_s0, 256 }
  0xec   : > { %s1616_s27 = scalar_lea.hbm %s2147_s26, 128  ;;  %p1622_p4 = scmp.lt.u32.totalorder %s2147_s26, %s2430_s0 }
  0xed   : > { %p1617_p8 = scmp.ne.s32.totalorder %s2147_s26, %s1616_s27  ;;  %p1623_p6 = scmp.lt.u32.totalorder %s1621_s30, %s1616_s27 }
  0xee   : > { %p1625_p10 = scmp.lt.u32.totalorder %s1616_s27, %s2147_s26 }
  0xef   : > { %p1619_p9 = pnand %p1618_p7, %p1617_p8  ;;  %p1624_p3 = por %p1623_p6, %p1622_p4 }
  0xf1   : > { %p1620_p1 = pneg %p1619_p9  ;;  %p1626_p13 = por %p1625_p10, %p1624_p3 }
  0xf3   : > { %p1627_p2 = pnand %p1626_p13, %p1620_p1 }
  0xf5   : > { %1630 = shalt.err (!%p1627_p2)
}
  0xf6   : > { %s1631_s25 = scalar_lea.vmem %s2155_s3, 128  ;;  %s1816_s16 = smov [#allocation2]  }
  0xf7   : > { %p1632_p8 = scmp.ne.s32.totalorder %s2155_s3, %s1631_s25  ;;  %s1636_s15 = sshll.u32 %s1816_s16, 4  ;;  %s1637_s15 = int_to_ptr.vmem [resolvable:$false] %s1636_s15 }
  0xf8   : > { %s1638_s13 = scalar_lea.vmem %s1637_s15, 256  ;;  %p1639_p12 = scmp.lt.s32.totalorder %s2155_s3, %s1637_s15 }
  0xf9   : > { %p1634_p9 = pnand %p1632_p8, %p1618_p7  ;;  %p1640_p4 = scmp.lt.s32.totalorder %s1638_s13, %s1631_s25 }
  0xfb   : > { %p1635_p0 = pneg %p1634_p9  ;;  %p1641_p6 = por %p1640_p4, %p1639_p12 }
  0xfd   : > { %p1642_p3 = pnand %p1641_p6, %p1635_p0 }
  0xff   : > { %1645 = shalt.err (!%p1642_p3)
}
 0x100   : > { %1290 = dma.hbm_to_vmem [thread:$0]  (!%p2151_p5), %s2147_s26, 128, %s2155_s3, %s440_s9  }
 0x101   : > { %p2432_p1 = scmp.ne.s32.totalorder %s2419_s24, 0 }
 0x102   : > { %s2185_s27 = sand.u32 (!%p2432_p1), 1, %s1788_s18  }
 0x103   : > { %460 = sbr.rel (%p2432_p1) target bundleno = 995 (0x3e3), region = 56  ;;  %s1134_s30 = sshll.u32 (!%p2432_p1), %s2185_s27, 3 }
 0x104   : > { %s463_s14 = scalar_lea.sflag (!%p2432_p1), [#allocation3], %s2185_s27  ;;  %s466_s28 = scalar_lea.vmem (!%p2432_p1), [#allocation2], %s1134_s30 }
 0x10a   : > { %1755 = dma.done.wait (%p2124_p11), %s463_s14, 128  }
 0x10b   : > { %1757 = vsyncadd (%p2124_p11), %s463_s14, 4294967168  ;;  %p2433_p12 = scmp.eq.s32.totalorder %s1918_s23, 0 }
 0x10d   : > { %1759 = dma.done.wait (%p2433_p12), [#allocation6], 32   ;;  %p2434_p0 = pmov %p2433_p12 }
 0x10f   : > { %1761 = vsyncadd (%p2434_p0), [#allocation6], 4294967264  ;;  %p2435_p5 = pmov %p2434_p0 }
 0x110   : > { %p2436_p7 = pmov %p2434_p0 }
 0x111   : > { %1763 = dma.done.wait (%p2435_p5), [#allocation9], 272  }
 0x112   : > { %1765 = vsyncadd (%p2436_p7), [#allocation9], 4294967024  ;;  %p2437_p10 = pmov %p2434_p0 }
 0x113   : > { %p2438_p13 = pmov %p2434_p0 }
 0x114   : > { %1767 = dma.done.wait (%p2437_p10), [#allocation12], 272  }
 0x115   : > { %1769 = vsyncadd (%p2438_p13), [#allocation12], 4294967024  ;;  %p2439_p11 = pmov %p2434_p0 }
 0x116   : > { %p2440_p2 = pmov %p2434_p0 }
 0x117   : > { %1771 = dma.done.wait (%p2439_p11), [#allocation15], 272  }
 0x118   : > { %1773 = vsyncadd (%p2440_p2), [#allocation15], 4294967024  ;;  %vm551_vm0 = vcmask 261120   ;;  %v548_v0 = vld [vmem:[%s466_s28] sm:$0xff]  ;;  %v1384_v7 = vld [vmem:[#allocation8] sm:$0xff]   ;;  %v1817_v9 = vmov 0.0  }
 0x119   : > { %v552_v1 = vsel %vm551_vm0, %v548_v0, 0.0  ;;  %v1385_v8 = vld [vmem:[#allocation11] sm:$0xff]   ;;  %1198 = vmatprep.subr.bf16.mxu0 %v1817_v9  ;;  %1206 = vmatprep.subr.bf16.mxu1 %v1817_v9  ;;  %v1386_v10 = vld [vmem:[#allocation8 + $0x8] sm:$0xff]   ;;  %v1387_v11 = vld [vmem:[#allocation11 + $0x8] sm:$0xff]   ;;  %vm1818_vm1 = vmmov 0   ;;  %s2218_s24 = sshll.u32 %s2185_s27, 4 }
 0x11a   : > { %553 = vadd.xlane.f32.xlu0 %v552_v1  ;;  %1199 = vmatpush3.bf16.msra.mxu0 %v1384_v7  ;;  %v1146_v16 = vld [vmem:[#allocation5] ss:$0 sm:$0xff]  ;;  %v1147_v18 = vld [vmem:[#allocation7] ss:$0 sm:$0xff]  ;;  %v1388_v21 = vld [vmem:[#allocation14] sm:$0xff]   ;;  %vm775_vm2 = vcmask 60416  }
 0x11b   : > { %1207 = vmatpush3.bf16.msra.mxu1 %v1385_v8  ;;  %1200 = vmatprep.subr.bf16.mxu0 %v1817_v9  ;;  %v1389_v23 = vld [vmem:[#allocation14 + $0x8] sm:$0xff]   ;;  %v1152_v25 = vld [vmem:[#allocation13] ss:$0 sm:$0xff]  ;;  %s2221_s10 = scalar_lea.vmem [#allocation18], %s2218_s24  ;;  %s1819_s26 = smov 104  }
 0x11c   : > { %1208 = vmatprep.subr.bf16.mxu1 %v1817_v9  ;;  %1202 = vmatprep.mubr.msk.bf16.mxu0 %vm1818_vm1, %v1817_v9  ;;  %v1148_v24 = vld [vmem:[#allocation10] ss:$0 sm:$0xff]  ;;  %s1820_s3 = smov 120   ;;  %v1156_v39 = vld [vmem:[#allocation16] ss:$0 sm:$0xff]  ;;  %s2226_s29 = scalar_lea.vmem [#allocation17], %s2218_s24 }
 0x11d   : > { %1210 = vmatprep.mubr.msk.bf16.mxu1 %vm1818_vm1, %v1817_v9  ;;  %s1821_s9 = smov 112   ;;  %s2441_s25 = sld [smem:[#allocation28_spill]] }
 0x11e   : > { %1201 = vmatpush3.bf16.msra.mxu0 %v1386_v10  ;;  %s2231_s16 = scalar_lea.vmem [#allocation20], %s2218_s24  ;;  %s877_s15 = sshll.u32 %s2221_s10, 4  ;;  %s2240_s15 = int_to_ptr.vmem [resolvable:$true] %s877_s15 }
 0x11f   : > { %1209 = vmatpush3.bf16.msra.mxu1 %v1387_v11  ;;  %1214 = vmatprep.subr.bf16.mxu0 %v1817_v9  ;;  %s840_s13 = sand.u32 1, %s1918_s23   ;;  %s2442_s24 = sld [smem:[#allocation34_spill]] }
 0x120   : > { %s2254_s23 = scalar_lea.sflag [#allocation19], %s840_s13  ;;  %p2443_p9 = scmp.ne.s32.totalorder %s2428_s11, 0 }
 0x123   : > { %s2238_s30 = sshll.u32 %s2441_s25, 8 }
 0x1a7   : > { %v554_v2 = vpop.xlane.xlu0 %553 }
 0x1a8   : > { %v556_v3 = vmul.f32 0.03125, %v554_v2 }
 0x1aa   : > { %v557_v4 = vsub.f32 %v548_v0, %v556_v3 }
 0x1ac   : > { %v558_v5 = vmul.f32 %v557_v4, %v557_v4 }
 0x1ae   : > { %v559_v6 = vsel %vm551_vm0, %v558_v5, 0.0 }
 0x1af   : > { %560 = vadd.xlane.f32.xlu0 %v559_v6 }
 0x23c   : > { %v561_v12 = vpop.xlane.xlu0 %560 }
 0x23d   : > { %v562_v13 = vmul.f32 0.03125, %v561_v12 }
 0x23f   : > { %v563_v14 = vadd.f32 1e-05, %v562_v13 }
 0x241   : > { %1390 = vrsqrt.f32 %v563_v14 }
 0x24b   : > { %v1391_v15 = vpop.eup %1390 }
 0x24c   : > { %v565_v17 = vmul.f32 %v1391_v15, %v557_v4 }
 0x24e   : > { %v572_v19 = vmul.f32 %v1146_v16, %v565_v17 }
 0x250   : > { %v579_v20 = vadd.f32 %v1147_v18, %v572_v19 }
 0x252   : > { %v580_v22 = vpack.c.bf16 %v579_v20, %v579_v20 }
 0x254   : > { %1203 = vmatmul.mubr.msk.bf16.vlgmr.msra.gmra.mrb[0].mxu0 %vm551_vm0, %v580_v22  ;;  %1211 = vmatmul.mubr.msk.bf16.vlgmr.msra.gmra.mrb[0].mxu1 %vm551_vm0, %v580_v22 }
 0x255   : > { %1215 = vmatpush3.bf16.msra.mxu0 %v1388_v21  ;;  %1218 = vmatprep.mubr.msk.bf16.mxu0 %vm1818_vm1, %v1817_v9 }
 0x256   : > { %1216 = vmatprep.subr.bf16.mxu0 %v1817_v9 }
 0x259   : > { %1217 = vmatpush3.bf16.msra.mxu0 %v1389_v23 }
 0x25c   : > { %1219 = vmatmul.mubr.msk.bf16.vlgmr.msra.gmra.mrb[4].mxu0 %vm551_vm0, %v580_v22 }
 0x327   : > { %v641_v26 = vpop.f32.mrb[0].mxu0  ;;  %v705_v27 = vpop.f32.mrb[0].mxu1 }
 0x328   : > { %v642_v28 = vadd.f32 %v1148_v24, %v641_v26  ;;  %v706_v29 = vadd.f32 %v1152_v25, %v705_v27  ;;  %v1204_v30 = vpop.f32.mrb[1].mxu0  ;;  %v1212_v31 = vpop.f32.mrb[1].mxu1 }
 0x329   : > { %v644_v32 = vpop.f32.mrb[2].mxu0  ;;  %v708_v33 = vpop.f32.mrb[2].mxu1 }
 0x32a   : > { %v647_v34 = vmul.f32 0.35355338, %v642_v28  ;;  %v777_v35 = vpack.c.bf16 %v706_v29, %v706_v29  ;;  %v1205_v36 = vpop.f32.mrb[3].mxu0  ;;  %v1213_v37 = vpop.f32.mrb[3].mxu1 }
 0x32c   : > { %v774_v38 = vpack.c.bf16 %v647_v34, %v647_v34  ;;  %778 = vst.msk [vmem:[%s2221_s10] sm:$0xf] %vm775_vm2, %v777_v35  ;;  %825 = vrot.lane.b32.xlu0 %v777_v35, %s1819_s26  ;;  %792 = vrot.lane.b32.xlu1 %v777_v35, %s1820_s3 }
 0x32e   : > { %776 = vst.msk [vmem:[%s2226_s29] sm:$0xf] %vm775_vm2, %v774_v38 }
 0x32f   : > { %v768_v40 = vpop.f32.mrb[4].mxu0 }
 0x330   : > { %v769_v41 = vadd.f32 %v1156_v39, %v768_v40  ;;  %810 = vrot.lane.b32.xlu1 %v777_v35, %s1821_s9  ;;  %v1220_v42 = vpop.f32.mrb[5].mxu0 }
 0x331   : > { %v771_v43 = vpop.f32.mrb[6].mxu0 }
 0x332   : > { %v779_v44 = vpack.c.bf16 %v769_v41, %v769_v41  ;;  %v1221_v45 = vpop.f32.mrb[7].mxu0 }
 0x334   : > { %780 = vst.msk [vmem:[%s2231_s16] sm:$0xf] %vm775_vm2, %v779_v44  ;;  %784 = vrot.lane.b32.xlu1 %v774_v38, %s1820_s3 }
 0x338   : > { %805 = vrot.lane.b32.xlu1 %v774_v38, %s1821_s9 }
 0x33c   : > { %820 = vrot.lane.b32.xlu1 %v774_v38, %s1819_s26 }
 0x340   : > { %800 = vrot.lane.b32.xlu1 %v779_v44, %s1820_s3  ;;  %s1646_s3 = scalar_lea.vmem %s2240_s15, 256 }
 0x341   : > { %p1647_p8 = scmp.ne.s32.totalorder %s2240_s15, %s1646_s3 }
 0x343   : > { %p1648_p4 = pnand %p1647_p8, %p2443_p9 }
 0x344   : > { %815 = vrot.lane.b32.xlu1 %v779_v44, %s1821_s9  ;;  %s1822_s9 = smov [#allocation18]  }
 0x345   : > { %p1649_p6 = pneg %p1648_p4  ;;  %s1650_s25 = sshll.u32 %s1822_s9, 4  ;;  %s1651_s25 = int_to_ptr.vmem [resolvable:$false] %s1650_s25 }
 0x346   : > { %s1652_s0 = scalar_lea.vmem %s1651_s25, 512  ;;  %p1653_p3 = scmp.lt.s32.totalorder %s2240_s15, %s1651_s25 }
 0x347   : > { %p1654_p1 = scmp.lt.s32.totalorder %s1652_s0, %s1646_s3 }
 0x348   : > { %830 = vrot.lane.b32.xlu1 %v779_v44, %s1819_s26  ;;  %s2250_s26 = scalar_lea.hbm %s2442_s24, %s2238_s30 }
 0x349   : > { %p1655_p12 = por %p1654_p1, %p1653_p3 }
 0x34b   : > { %p1656_p0 = pnand %p1655_p12, %p1649_p6 }
 0x39e   : > { %v826_v46 = vpop.permute.xlu0 %825  ;;  %v793_v47 = vpop.permute.xlu1 %792 }
 0x39f   : > { %1170 = vst.msk [vmem:[%s2221_s10 + $0xc] sm:$0xf] %vm775_vm2, %v826_v46  ;;  %1163 = vst.msk [vmem:[%s2221_s10 + $0x4] sm:$0xf] %vm775_vm2, %v793_v47 }
 0x3a2   : > { %v811_v48 = vpop.permute.xlu1 %810 }
 0x3a3   : > { %1167 = vst.msk [vmem:[%s2221_s10 + $0x8] sm:$0xf] %vm775_vm2, %v811_v48 }
 0x3a4   : > { %1659 = shalt.err (!%p1656_p0)
}
 0x3a5   : > { %s1660_s10 = scalar_lea.hbm %s2250_s26, 256  ;;  %s1664_s28 = scalar_lea.hbm %s2442_s24, 512 }
 0x3a6   : > { %p1661_p5 = scmp.ne.s32.totalorder %s2250_s26, %s1660_s10  ;;  %p1665_p13 = scmp.lt.u32.totalorder %s2250_s26, %s2442_s24 }
 0x3a7   : > { %p1666_p11 = scmp.lt.u32.totalorder %s1664_s28, %s1660_s10  ;;  %p1668_p8 = scmp.lt.u32.totalorder %s1660_s10, %s2250_s26 }
 0x3a8   : > { %p1662_p7 = pnand %p1661_p5, %p2443_p9 }
 0x3a9   : > { %p1667_p2 = por %p1666_p11, %p1665_p13 }
 0x3aa   : > { %p1663_p10 = pneg %p1662_p7 }
 0x3ab   : > { %p1669_p4 = por %p1668_p8, %p1667_p2 }
 0x3ad   : > { %p1670_p6 = pnand %p1669_p4, %p1663_p10 }
 0x3af   : > { %1673 = shalt.err (!%p1670_p6)
}
 0x3b0   : > { %s2407_s0 = smov 64   ;;  %s2409_s3 = smov 4   ;;  %v785_v49 = vpop.permute.xlu1 %784 }
 0x3b1   : > { %1257 = dma.vmem_to_hbm [thread:$0]  (%p2443_p9), %s2240_s15, 256, %s2250_s26, %s2254_s23, %s2407_s0, %s2407_s0, %s2409_s3  }
 0x3b2   : > { %1161 = vst.msk [vmem:[%s2226_s29 + $0x4] sm:$0xf] %vm775_vm2, %v785_v49  ;;  %s860_s10 = sshll.u32 %s2226_s29, 4  ;;  %s2444_s28 = sld [smem:[#allocation33_spill]]  ;;  %s2286_s10 = int_to_ptr.vmem [resolvable:$true] %s860_s10 }
 0x3b3   : > { %s1674_s26 = scalar_lea.vmem %s2286_s10, 256  ;;  %s1825_s25 = smov [#allocation17]  }
 0x3b4   : > { %v806_v50 = vpop.permute.xlu1 %805  ;;  %p1675_p3 = scmp.ne.s32.totalorder %s2286_s10, %s1674_s26  ;;  %s1678_s0 = sshll.u32 %s1825_s25, 4  ;;  %s1679_s0 = int_to_ptr.vmem [resolvable:$false] %s1678_s0 }
 0x3b5   : > { %1166 = vst.msk [vmem:[%s2226_s29 + $0x8] sm:$0xf] %vm775_vm2, %v806_v50  ;;  %s1680_s3 = scalar_lea.vmem %s1679_s0, 512  ;;  %p1681_p0 = scmp.lt.s32.totalorder %s2286_s10, %s1679_s0 }
 0x3b6   : > { %p1676_p1 = pnand %p1675_p3, %p2443_p9  ;;  %p1682_p5 = scmp.lt.s32.totalorder %s1680_s3, %s1674_s26 }
 0x3b8   : > { %s2292_s9 = scalar_lea.hbm %s2444_s28, %s2238_s30  ;;  %v821_v51 = vpop.permute.xlu1 %820  ;;  %p1677_p12 = pneg %p1676_p1 }
 0x3b9   : > { %1169 = vst.msk [vmem:[%s2226_s29 + $0xc] sm:$0xf] %vm775_vm2, %v821_v51  ;;  %p1683_p7 = por %p1682_p5, %p1681_p0 }
 0x3bb   : > { %p1684_p10 = pnand %p1683_p7, %p1677_p12 }
 0x3bd   : > { %1687 = shalt.err (!%p1684_p10)
}
 0x3be   : > { %s1688_s29 = scalar_lea.hbm %s2292_s9, 256  ;;  %s1692_s25 = scalar_lea.hbm %s2444_s28, 512 }
 0x3bf   : > { %p1689_p13 = scmp.ne.s32.totalorder %s2292_s9, %s1688_s29  ;;  %p1693_p8 = scmp.lt.u32.totalorder %s2292_s9, %s2444_s28 }
 0x3c0   : > { %p1694_p4 = scmp.lt.u32.totalorder %s1692_s25, %s1688_s29  ;;  %p1696_p3 = scmp.lt.u32.totalorder %s1688_s29, %s2292_s9 }
 0x3c1   : > { %p1690_p11 = pnand %p1689_p13, %p2443_p9 }
 0x3c2   : > { %p1695_p6 = por %p1694_p4, %p1693_p8 }
 0x3c3   : > { %p1691_p2 = pneg %p1690_p11 }
 0x3c4   : > { %p1697_p1 = por %p1696_p3, %p1695_p6 }
 0x3c6   : > { %p1698_p12 = pnand %p1697_p1, %p1691_p2 }
 0x3c8   : > { %1701 = shalt.err (!%p1698_p12)
}
 0x3c9   : > { %s2445_s3 = smov 4   ;;  %s2446_s26 = smov 64   ;;  %v801_v52 = vpop.permute.xlu1 %800 }
 0x3ca   : > { %s2447_s2 = scalar_lea.sflag [#allocation4], %s2185_s27  ;;  %1165 = vst.msk [vmem:[%s2231_s16 + $0x4] sm:$0xf] %vm775_vm2, %v801_v52  ;;  %s894_s15 = sshll.u32 %s2231_s16, 4  ;;  %s2328_s15 = int_to_ptr.vmem [resolvable:$true] %s894_s15 }
 0x3cb   : > { %1256 = dma.vmem_to_hbm [thread:$0]  (%p2443_p9), %s2286_s10, 256, %s2292_s9, %s2447_s2, %s2446_s26, %s2446_s26, %s2445_s3  }
 0x3cc   : > { %s2448_s13 = sld [smem:[#allocation35_spill]]  ;;  %s1702_s2 = scalar_lea.vmem %s2328_s15, 256 }
 0x3cd   : > { %v816_v53 = vpop.permute.xlu1 %815  ;;  %p1703_p0 = scmp.ne.s32.totalorder %s2328_s15, %s1702_s2  ;;  %s1826_s10 = smov [#allocation20]  }
 0x3ce   : > { %1168 = vst.msk [vmem:[%s2231_s16 + $0x8] sm:$0xf] %vm775_vm2, %v816_v53  ;;  %s1706_s9 = sshll.u32 %s1826_s10, 4  ;;  %s1707_s9 = int_to_ptr.vmem [resolvable:$false] %s1706_s9 }
 0x3cf   : > { %p1704_p5 = pnand %p1703_p0, %p2443_p9  ;;  %s1708_s25 = scalar_lea.vmem %s1707_s9, 512 }
 0x3d0   : > { %p1709_p10 = scmp.lt.s32.totalorder %s2328_s15, %s1707_s9  ;;  %p1710_p13 = scmp.lt.s32.totalorder %s1708_s25, %s1702_s2 }
 0x3d1   : > { %v831_v54 = vpop.permute.xlu1 %830  ;;  %p1705_p7 = pneg %p1704_p5 }
 0x3d2   : > { %s2334_s14 = scalar_lea.hbm %s2448_s13, %s2238_s30  ;;  %1171 = vst.msk [vmem:[%s2231_s16 + $0xc] sm:$0xf] %vm775_vm2, %v831_v54  ;;  %p1711_p11 = por %p1710_p13, %p1709_p10 }
 0x3d4   : > { %p1712_p2 = pnand %p1711_p11, %p1705_p7 }
 0x3d6   : > { %1715 = shalt.err (!%p1712_p2)
}
 0x3d7   : > { %s1716_s16 = scalar_lea.hbm %s2334_s14, 256  ;;  %s1720_s29 = scalar_lea.hbm %s2448_s13, 512 }
 0x3d8   : > { %p1717_p8 = scmp.ne.s32.totalorder %s2334_s14, %s1716_s16  ;;  %p1721_p3 = scmp.lt.u32.totalorder %s2334_s14, %s2448_s13 }
 0x3d9   : > { %p1722_p1 = scmp.lt.u32.totalorder %s1720_s29, %s1716_s16  ;;  %p1724_p0 = scmp.lt.u32.totalorder %s1716_s16, %s2334_s14 }
 0x3da   : > { %p1718_p4 = pnand %p1717_p8, %p2443_p9 }
 0x3db   : > { %p1723_p12 = por %p1722_p1, %p1721_p3 }
 0x3dc   : > { %p1719_p6 = pneg %p1718_p4 }
 0x3dd   : > { %p1725_p5 = por %p1724_p0, %p1723_p12 }
 0x3df   : > { %p1726_p7 = pnand %p1725_p5, %p1719_p6 }
 0x3e1   : > { %1729 = shalt.err (!%p1726_p7)
}
 0x3e2   : > { %1258 = dma.vmem_to_hbm [thread:$0]  (%p2443_p9), %s2328_s15, 256, %s2334_s14, %s2254_s23, %s2446_s26, %s2446_s26, %s2445_s3  }
 0x3e3 PF: > { %s909_s2 = sand.u32 1, %s1784_s17   ;;  %p2449_p10 = scmp.ne.s32.totalorder %s2429_s20, 0 }
 0x3e4   : > { %p2450_p13 = scmp.ge.s32.totalorder %s1804_s22, 2  ;;  %s910_s9 = scalar_lea.sflag [#allocation4], %s909_s2 }
 0x3e6   : > { %p1292_p11 = pnand %p2450_p13, %p2449_p10 }
 0x3e8   : > { %1775 = dma.done.wait (!%p1292_p11), %s910_s9, 256  }
 0x3e9   : > { %1777 = vsyncadd (!%p1292_p11), %s910_s9, 4294967040  ;;  %s2451_s11 = sadd.s32 4294967294, %s1804_s22  }
 0x3ea   : > { %s918_s25 = sand.u32 1, %s2451_s11  }
 0x3eb   : > { %s919_s16 = scalar_lea.sflag [#allocation19], %s918_s25 }
 0x3ec   : > { %1779 = dma.done.wait (!%p1292_p11), %s919_s16, 512  }
 0x3ed   : > { %1781 = vsyncadd (!%p1292_p11), %s919_s16, 4294966784  ;;  %s35_s22 = sadd.s32 1, %s1804_s22   ;;  %s2452_s17 = smov %s1788_s18 }
 0x3ee   : > { %p32_p9 = scmp.ge.s32.totalorder %s35_s22, 4   ;;  %s2453_s18 = smov %s1792_s19 }
 0x3ef   : > { %s2454_s19 = smov %s2135_s12  ;;  %s2455_s20 = smov %s1800_s21 }
 0x3f0   : > { %s2456_s21 = smov %s2458_s1  ;;  %34 = sbr.rel (!%p32_p9) target bundleno = 20 (0x14), region = 174 }
 0x3f7   :  { %933 = vsyncpa [#allocation3], 1 }
 0x3f8   :  { %935 = vsyncpa [#allocation3 + $0x1], 1 }
 0x3f9   :  { %936 = vsyncpa [#allocation6], 1 }
 0x3fa   :  { %937 = vsyncpa [#allocation9], 1 }
 0x3fb   :  { %938 = vsyncpa [#allocation12], 1 }
 0x3fc   :  { %939 = vsyncpa [#allocation15], 1 }
 0x3fd   :  { %940 = vsyncpa [#allocation4], 1 }
 0x3fe   :  { %942 = vsyncpa [#allocation4 + $0x1], 1 }
 0x3ff   :  { %943 = vsyncpa [#allocation19], 1 }
 0x400   :  { %945 = vsyncpa [#allocation19 + $0x1], 1 }

</bundles_post_ra>
